<compile_context>
chip_gen: v7x
topology: tpu7x:2x2x1
jax: 0.10.0
libtpu: 0.0.40
codegen_flags: <defaults>
</compile_context>

<pallas_src>
import jax
import jax.numpy as jnp
from jax.experimental import pallas as pl
from jax.experimental.pallas import tpu as pltpu


def _round_up(x, m):
    return ((x + m - 1) // m) * m


def _make_mlp_kernel(n_hidden: int, negative_slope: float = 0.2):
    """Kernel computing the Discriminator MLP on one (features, TM) row tile."""

    def kernel(x_ref, *refs):
        o_ref = refs[-1]
        param_refs = refs[:-1]  # w0, b0, w1, b1, ..., w_last, b_last

        h_bf = x_ref[...]                       # (pacdim, TM) bf16
        h_f32 = h_bf.astype(jnp.float32)
        for i in range(n_hidden):
            w = param_refs[2 * i][...]          # (out, in)  bf16, resident
            b = param_refs[2 * i + 1][...]      # (out, 1)   f32,  resident
            z = jnp.dot(w, h_bf, preferred_element_type=jnp.float32) + b
            # LeakyReLU(0.2)
            z = jnp.where(z > 0, z, negative_slope * z)
            # Dropout(0.5): eval-mode identity
            h_f32 = z
            h_bf = z.astype(jnp.bfloat16)

        # Final Linear(dim, 1): broadcast weight over lanes, multiply on the
        # VPU and reduce over the (small) feature/sublane axis on the XLU
        # instead of paying for an N=1 MXU matmul.
        w_last = param_refs[-2][...]            # (dim_last, 1) f32
        b_last = param_refs[-1][...]            # (1, 1)        f32
        o_ref[...] = jnp.sum(h_f32 * w_last, axis=0, keepdims=True) + b_last

    return kernel


def discriminator_forward(x, params, *, pac, tm_max=2048):
    """params: list of (W, b) with W shaped (in_features, out_features)."""
    input_dim = x.shape[-1]
    pacdim = input_dim * pac
    if x.size % pacdim != 0:
        raise ValueError(
            f"total elements ({x.size}) must be divisible by input_dim*pac ({pacdim})"
        )
    xr = x.reshape(-1, pacdim)                  # .view(-1, self.pacdim)
    n_rows = xr.shape[0]

    n_layers = len(params)
    n_hidden = n_layers - 1

    # Rows on the lane axis: pad rows up to a multiple of the tile size (>=128).
    tm = min(tm_max, _round_up(max(n_rows, 1), 128))
    n_padded = _round_up(n_rows, tm)
    xt = jnp.pad(xr.T.astype(jnp.bfloat16), ((0, 0), (0, n_padded - n_rows)))

    flat_params = []
    in_specs = [pl.BlockSpec((pacdim, tm), lambda i: (0, i))]
    for li, (w, b) in enumerate(params):
        if li < n_hidden:
            wt = w.T.astype(jnp.bfloat16)                  # (out, in), bf16
            bt = b.reshape(-1, 1).astype(jnp.float32)      # (out, 1)
        else:
            wt = w.reshape(-1, 1).astype(jnp.float32)      # (dim_last, 1)
            bt = b.reshape(1, 1).astype(jnp.float32)       # (1, 1)
        flat_params += [wt, bt]
        # Constant index_map -> weights/biases stay resident across row tiles.
        in_specs += [
            pl.BlockSpec(wt.shape, lambda i: (0, 0)),
            pl.BlockSpec(bt.shape, lambda i: (0, 0)),
        ]

    out_shape = jax.ShapeDtypeStruct((1, n_padded), jnp.float32)
    out_specs = pl.BlockSpec((1, tm), lambda i: (0, i))

    # Advisory cost estimate so XLA can schedule around this call.
    dims = [pacdim] + [w.shape[1] for (w, _) in params]
    flops = sum(2 * n_padded * dims[i] * dims[i + 1] for i in range(n_layers))
    bytes_accessed = (
        xt.size * xt.dtype.itemsize
        + sum(p.size * p.dtype.itemsize for p in flat_params)
        + n_padded * 4
    )

    out = pl.pallas_call(
        _make_mlp_kernel(n_hidden),
        out_shape=out_shape,
        grid=(n_padded // tm,),
        in_specs=in_specs,
        out_specs=out_specs,
        compiler_params=pltpu.CompilerParams(
            dimension_semantics=("parallel",),
        ),
        cost_estimate=pl.CostEstimate(
            flops=flops, transcendentals=0, bytes_accessed=bytes_accessed
        ),
    )(xt, *flat_params)

    # (1, n_padded) -> (n_rows, 1) to match PyTorch's output layout.
    return out[:, :n_rows].T


def init_discriminator_params(key, input_dim, discriminator_dim, pac):
    """Deterministic init matching PyTorch Linear shapes (uniform(-1/sqrt(in), 1/sqrt(in)))."""
    params = []
    dim = input_dim * pac
    dims = list(discriminator_dim) + [1]
    for out_dim in dims:
        key, kw, kb = jax.random.split(key, 3)
        bound = 1.0 / jnp.sqrt(jnp.float32(dim))
        w = jax.random.uniform(kw, (dim, out_dim), jnp.float32, -bound, bound)
        b = jax.random.uniform(kb, (out_dim,), jnp.float32, -bound, bound)
        params.append((w, b))
        dim = out_dim
    return params


def _reference_forward(x, params, pac):
    input_dim = x.shape[-1]
    h = x.reshape(-1, input_dim * pac).astype(jnp.float32)
    for i, (w, b) in enumerate(params):
        h = h @ w + b
        if i < len(params) - 1:
            h = jnp.where(h > 0, h, 0.2 * h)
    return h


if __name__ == "__main__":
    # Small shapes consistent with the module.
    input_dim = 8
    pac = 4
    discriminator_dim = (32, 16)
    batch = 8  # must be a multiple of pac

    key = jax.random.PRNGKey(0)
    key, kx = jax.random.split(key)
    x = jax.random.normal(kx, (batch, input_dim), jnp.float32)

    params = init_discriminator_params(key, input_dim, discriminator_dim, pac)

    out = discriminator_forward(x, params, pac=pac)
    out = jax.block_until_ready(out)

    ref = _reference_forward(x, params, pac)
    assert out.shape == (batch // pac, 1), out.shape
    # bf16 matmuls with f32 accumulation -> compare against the f32 reference
    # with a bf16-appropriate tolerance.
    assert jnp.allclose(out, ref, atol=5e-2, rtol=5e-2), (out, ref)

    print("KERNEL_OK")
</pallas_src>

<mosaic_0001>
module attributes {stable_mosaic.version = 11 : i64} {
  func.func @kernel(%arg0: i32, %arg1: memref<32x128xbf16, #tpu.memory_space<vmem>>, %arg2: memref<32x32xbf16, #tpu.memory_space<vmem>>, %arg3: memref<32x1xf32, #tpu.memory_space<vmem>>, %arg4: memref<16x32xbf16, #tpu.memory_space<vmem>>, %arg5: memref<16x1xf32, #tpu.memory_space<vmem>>, %arg6: memref<16x1xf32, #tpu.memory_space<vmem>>, %arg7: memref<1x1xf32, #tpu.memory_space<vmem>>, %arg8: memref<1x128xf32, #tpu.memory_space<vmem>>) attributes {dimension_semantics = [#tpu.dimension_semantics<parallel>], iteration_bounds = array<i64: 1>, scalar_prefetch = 0 : i64, scratch_operands = 0 : i64, tpu.core_type = #tpu.core_type<tc>, window_params = [{transform_indices = @transform_0, window_bounds = array<i64: 32, 128>}, {pipeline_mode = #tpu.pipeline_mode<synchronous>, transform_indices = @transform_1, window_bounds = array<i64: 32, 32>}, {pipeline_mode = #tpu.pipeline_mode<synchronous>, transform_indices = @transform_2, window_bounds = array<i64: 32, 1>}, {pipeline_mode = #tpu.pipeline_mode<synchronous>, transform_indices = @transform_3, window_bounds = array<i64: 16, 32>}, {pipeline_mode = #tpu.pipeline_mode<synchronous>, transform_indices = @transform_4, window_bounds = array<i64: 16, 1>}, {pipeline_mode = #tpu.pipeline_mode<synchronous>, transform_indices = @transform_5, window_bounds = array<i64: 16, 1>}, {pipeline_mode = #tpu.pipeline_mode<synchronous>, transform_indices = @transform_6, window_bounds = array<i64: 1, 1>}, {transform_indices = @transform_7, window_bounds = array<i64: 1, 128>}]} {
    %c0 = arith.constant 0 : index
    %c0_0 = arith.constant 0 : index
    %0 = vector.load %arg1[%c0, %c0_0] : memref<32x128xbf16, #tpu.memory_space<vmem>>, vector<32x128xbf16>
    %c0_1 = arith.constant 0 : index
    %c0_2 = arith.constant 0 : index
    %1 = vector.load %arg2[%c0_1, %c0_2] : memref<32x32xbf16, #tpu.memory_space<vmem>>, vector<32x32xbf16>
    %c0_3 = arith.constant 0 : index
    %c0_4 = arith.constant 0 : index
    %2 = vector.load %arg3[%c0_3, %c0_4] : memref<32x1xf32, #tpu.memory_space<vmem>>, vector<32x1xf32>
    %cst = arith.constant dense<0.000000e+00> : vector<32x128xf32>
    %3 = tpu.matmul %1, %0, %cst {dimension_numbers = #tpu.dot_dimension_numbers<[1], [0], [0], [1], [0, 0, 1, 1], [], []>} : vector<32x32xbf16>, vector<32x128xbf16>, vector<32x128xf32> -> vector<32x128xf32>
    %4 = vector.broadcast %2 : vector<32x1xf32> to vector<32x128xf32>
    %5 = arith.addf %3, %4 : vector<32x128xf32>
    %cst_5 = arith.constant 0.000000e+00 : f32
    %6 = vector.broadcast %cst_5 : f32 to vector<32x128xf32>
    %7 = arith.cmpf ogt, %5, %6 : vector<32x128xf32>
    %cst_6 = arith.constant 2.000000e-01 : f32
    %8 = vector.broadcast %cst_6 : f32 to vector<32x128xf32>
    %9 = arith.mulf %8, %5 : vector<32x128xf32>
    %10 = arith.select %7, %5, %9 : vector<32x128xi1>, vector<32x128xf32>
    %11 = arith.truncf %10 : vector<32x128xf32> to vector<32x128xbf16>
    %c0_7 = arith.constant 0 : index
    %c0_8 = arith.constant 0 : index
    %12 = vector.load %arg4[%c0_7, %c0_8] : memref<16x32xbf16, #tpu.memory_space<vmem>>, vector<16x32xbf16>
    %c0_9 = arith.constant 0 : index
    %c0_10 = arith.constant 0 : index
    %13 = vector.load %arg5[%c0_9, %c0_10] : memref<16x1xf32, #tpu.memory_space<vmem>>, vector<16x1xf32>
    %cst_11 = arith.constant dense<0.000000e+00> : vector<16x128xf32>
    %14 = tpu.matmul %12, %11, %cst_11 {dimension_numbers = #tpu.dot_dimension_numbers<[1], [0], [0], [1], [0, 0, 1, 1], [], []>} : vector<16x32xbf16>, vector<32x128xbf16>, vector<16x128xf32> -> vector<16x128xf32>
    %15 = vector.broadcast %13 : vector<16x1xf32> to vector<16x128xf32>
    %16 = arith.addf %14, %15 : vector<16x128xf32>
    %cst_12 = arith.constant 0.000000e+00 : f32
    %17 = vector.broadcast %cst_12 : f32 to vector<16x128xf32>
    %18 = arith.cmpf ogt, %16, %17 : vector<16x128xf32>
    %cst_13 = arith.constant 2.000000e-01 : f32
    %19 = vector.broadcast %cst_13 : f32 to vector<16x128xf32>
    %20 = arith.mulf %19, %16 : vector<16x128xf32>
    %21 = arith.select %18, %16, %20 : vector<16x128xi1>, vector<16x128xf32>
    %c0_14 = arith.constant 0 : index
    %c0_15 = arith.constant 0 : index
    %22 = vector.load %arg6[%c0_14, %c0_15] : memref<16x1xf32, #tpu.memory_space<vmem>>, vector<16x1xf32>
    %c0_16 = arith.constant 0 : index
    %c0_17 = arith.constant 0 : index
    %23 = vector.load %arg7[%c0_16, %c0_17] : memref<1x1xf32, #tpu.memory_space<vmem>>, vector<1x1xf32>
    %24 = vector.broadcast %22 : vector<16x1xf32> to vector<16x128xf32>
    %25 = arith.mulf %21, %24 : vector<16x128xf32>
    %cst_18 = arith.constant dense<0.000000e+00> : vector<128xf32>
    %26 = vector.multi_reduction <add>, %25, %cst_18 [0] : vector<16x128xf32> to vector<128xf32>
    %27 = vector.shape_cast %26 : vector<128xf32> to vector<1x128xf32>
    %28 = vector.broadcast %23 : vector<1x1xf32> to vector<1x128xf32>
    %29 = arith.addf %27, %28 : vector<1x128xf32>
    %c0_19 = arith.constant 0 : index
    %c0_20 = arith.constant 0 : index
    %30 = vector.load %arg8[%c0_19, %c0_20] : memref<1x128xf32, #tpu.memory_space<vmem>>, vector<1x128xf32>
    tpu.vector_store %arg8[%c0_19, %c0_20], %29 {strides = array<i32>} : memref<1x128xf32, #tpu.memory_space<vmem>>, vector<1x128xf32>,
    return
  }
  func.func @transform_0(%arg0: i32) -> (i32, i32) {
    %c0_i32 = arith.constant 0 : i32
    %c0_i32_0 = arith.constant 0 : i32
    return %c0_i32, %arg0 : i32, i32
  }
  func.func @transform_1(%arg0: i32) -> (i32, i32) {
    %c0_i32 = arith.constant 0 : i32
    %c0_i32_0 = arith.constant 0 : i32
    %c0_i32_1 = arith.constant 0 : i32
    return %c0_i32, %c0_i32_0 : i32, i32
  }
  func.func @transform_2(%arg0: i32) -> (i32, i32) {
    %c0_i32 = arith.constant 0 : i32
    %c0_i32_0 = arith.constant 0 : i32
    %c0_i32_1 = arith.constant 0 : i32
    return %c0_i32, %c0_i32_0 : i32, i32
  }
  func.func @transform_3(%arg0: i32) -> (i32, i32) {
    %c0_i32 = arith.constant 0 : i32
    %c0_i32_0 = arith.constant 0 : i32
    %c0_i32_1 = arith.constant 0 : i32
    return %c0_i32, %c0_i32_0 : i32, i32
  }
  func.func @transform_4(%arg0: i32) -> (i32, i32) {
    %c0_i32 = arith.constant 0 : i32
    %c0_i32_0 = arith.constant 0 : i32
    %c0_i32_1 = arith.constant 0 : i32
    return %c0_i32, %c0_i32_0 : i32, i32
  }
  func.func @transform_5(%arg0: i32) -> (i32, i32) {
    %c0_i32 = arith.constant 0 : i32
    %c0_i32_0 = arith.constant 0 : i32
    %c0_i32_1 = arith.constant 0 : i32
    return %c0_i32, %c0_i32_0 : i32, i32
  }
  func.func @transform_6(%arg0: i32) -> (i32, i32) {
    %c0_i32 = arith.constant 0 : i32
    %c0_i32_0 = arith.constant 0 : i32
    %c0_i32_1 = arith.constant 0 : i32
    return %c0_i32, %c0_i32_0 : i32, i32
  }
  func.func @transform_7(%arg0: i32) -> (i32, i32) {
    %c0_i32 = arith.constant 0 : i32
    %c0_i32_0 = arith.constant 0 : i32
    return %c0_i32, %arg0 : i32, i32
  }
}

</mosaic_0001>

<bundles_post_ra>
// kernel: tpu_custom_call.1
= control target key start
LH: loop header
LB: loop body
LE: loop exit
PB: predicated region body
PF: predicated region fallthrough
CT: control target
= control target key end

     0   :  { %s437_s0 = inlined_call_operand.vmem [shape: bf16[32,128], index: 0, kind: input, shape index: {}]   ;;  %s438_s1 = inlined_call_operand.vmem [shape: bf16[32,32], index: 1, kind: input, shape index: {}]   ;;  %s439_s2 = inlined_call_operand.vmem [shape: f32[32,1], index: 2, kind: input, shape index: {}]   ;;  %s440_s3 = inlined_call_operand.vmem [shape: bf16[16,32], index: 3, kind: input, shape index: {}]   ;;  %s441_s4 = inlined_call_operand.vmem [shape: f32[16,1], index: 4, kind: input, shape index: {}]   ;;  %s442_s5 = inlined_call_operand.vmem [shape: f32[16,1], index: 5, kind: input, shape index: {}]   ;;  %s443_s6 = inlined_call_operand.<no memory space> [shape: f32[1,1], index: 6, kind: input, shape index: {}]   ;;  %s444_s7 = inlined_call_operand.hbm [shape: f32[1,128], index: 7, kind: output, shape index: {}]  }
   0x1   :  { %v12_v0 = vstv %s443_s6 }
   0x2   :  { %13 = vst [vmem:[#allocation2] sm:$0x1] %v12_v0 }
   0x3   :  { %v307_v1 = vld [vmem:[%s437_s0] sm:$0xff]   ;;  %vm84_vm0 = vcmask 261120   ;;  %v308_v2 = vld [vmem:[%s437_s0 + $0x8] sm:$0xff]   ;;  %v336_v4 = vmov 0   ;;  %v40_v6 = vld [vmem:[%s439_s2 + $0x10] sm:$0xff] }
   0x4   :  { %285 = vmatprep.subr.bf16.mxu0 %v307_v1  ;;  %v309_v3 = vld [vmem:[%s438_s1] sm:$0xff]   ;;  %305 = vset.pattern.permute.xlu0 %v336_v4  ;;  %v310_v7 = vld [vmem:[%s438_s1 + $0x8] sm:$0xff]   ;;  %v41_v9 = vld [vmem:[%s439_s2 + $0x18] sm:$0xff] }
   0x5   :  { %286 = vmatpush3.bf16.msra.mxu0 %v307_v1  ;;  %306 = vset.pattern.permute.xlu1 %v336_v4  ;;  %v38_v5 = vld [vmem:[%s439_s2] sm:$0xff]  ;;  %v39_v8 = vld [vmem:[%s439_s2 + $0x8] sm:$0xff] }
   0x6   :  { %287 = vmatprep.subr.bf16.mxu0 %v308_v2  ;;  %289 = vmatprep.mubr.msk.bf16.mxu0 %vm84_vm0, %v309_v3 }
   0x7   :  { %44 = vperm.xlu0 %305, %v38_v5   ;;  %54 = vperm.xlu1 %306, %v40_v6  }
   0x9   :  { %288 = vmatpush3.bf16.msra.mxu0 %v308_v2 }
   0xa   :  { %14 = vsyncpa [#allocation4], 0  ;;  %v156_v10 = vld [vmem:[%s441_s4] sm:$0xff]  ;;  %v157_v11 = vld [vmem:[%s441_s4 + $0x8] sm:$0xff]  ;;  %v337_v15 = vmov 0.0   ;;  %vm338_vm1 = vmmov 0   ;;  %v250_v55 = vlaneseq }
   0xb   :  { %49 = vperm.xlu0 %305, %v39_v8   ;;  %59 = vperm.xlu1 %306, %v41_v9   ;;  %v223_v12 = vld [vmem:[%s442_s5] sm:$0xff]  ;;  %v224_v13 = vld [vmem:[%s442_s5 + $0x8] sm:$0xff] }
   0xc   :  { %290 = vmatmul.mubr.msk.bf16.vlgmr.msra.gmra.mrb[0].mxu0 %vm84_vm0, %v310_v7  ;;  %v225_v14 = vld [vmem:[#allocation2] sm:$0x1]  ;;  %293 = vmatprep.subr.bf16.mxu1 %v337_v15  ;;  %v251_v58 = vshrl.u32 %v250_v55, 7 }
   0xd   :  { %297 = vmatprep.mubr.msk.bf16.mxu1 %vm338_vm1, %v337_v15  ;;  %v311_v38 = vld [vmem:[%s440_s3] sm:$0xff]   ;;  %s339_s3 = smov [#allocation3]  }
   0xe   :  { %v252_v61 = vsub.s32 0, %v251_v58  ;;  %s262_s23 = sshll.u32 %s339_s3, 4  ;;  %s263_s23 = int_to_ptr.vmem [resolvable:$true] %s262_s23 }
   0xf   :  { %160 = vperm.xlu0 %305, %v156_v10   ;;  %165 = vperm.xlu1 %306, %v157_v11   ;;  %s312_s24 = scalar_lea.vmem %s263_s23, 16  ;;  %s316_s25 = scalar_lea.vmem %s263_s23, 32 }
  0x10   :  { %p313_p0 = scmp.ne.s32.totalorder %s263_s23, %s312_s24  ;;  %p317_p1 = scmp.lt.s32.totalorder %s263_s23, %s263_s23 }
  0x11   :  { %p318_p2 = scmp.lt.s32.totalorder %s316_s25, %s312_s24 }
  0x13   :  { %228 = vperm.xlu0 %305, %v223_v12   ;;  %233 = vperm.xlu1 %306, %v224_v13   ;;  %p319_p3 = por %p318_p2, %p317_p1 }
  0x15   :  { %p320_p4 = pnand %p319_p3, %p313_p0 }
  0x17   :  { %247 = vperm.xlu0 %305, %v225_v14  }
  0x86   :  { %v55_v16 = vpop.permute.xlu1 %54  ;;  %v45_v17 = vpop.permute.xlu0 %44 }
  0x8a   :  { %v60_v21 = vpop.permute.xlu1 %59  ;;  %v50_v24 = vpop.permute.xlu0 %49 }
  0x8e   :  { %v161_v39 = vpop.permute.xlu0 %160  ;;  %v166_v41 = vpop.permute.xlu1 %165 }
  0x92   :  { %v229_v50 = vpop.permute.xlu0 %228  ;;  %v234_v51 = vpop.permute.xlu1 %233 }
  0x96   :  { %v248_v63 = vpop.permute.xlu0 %247 }
  0x97   :  { %v253_v1 = vrot.slane %v248_v63, %v252_v61 }
  0xdf   :  { %v291_v18 = vpop.f32.mrb[0].mxu0 }
  0xe0   :  { %v134_v19 = vadd.f32 %v291_v18, %v55_v16  ;;  %v125_v20 = vpop.f32.mrb[1].mxu0 }
  0xe1   :  { %v126_v22 = vadd.f32 %v125_v20, %v45_v17  ;;  %v292_v23 = vpop.f32.mrb[2].mxu0 }
  0xe2   :  { %v146_v25 = vmul.f32 0.2, %v134_v19  ;;  %v137_v26 = vadd.f32 %v292_v23, %v60_v21  ;;  %v128_v27 = vpop.f32.mrb[3].mxu0  ;;  %vm142_vm2 = vcmp.gt.f32.partialorder %v134_v19, 0.0 }
  0xe3   :  { %v144_v28 = vmul.f32 0.2, %v126_v22  ;;  %v129_v29 = vadd.f32 %v128_v27, %v50_v24  ;;  %vm140_vm4 = vcmp.gt.f32.partialorder %v126_v22, 0.0 }
  0xe4   :  { %vm143_vm3 = vcmp.gt.f32.partialorder %v137_v26, 0.0  ;;  %v147_v30 = vmul.f32 0.2, %v137_v26  ;;  %v150_v32 = vsel %vm142_vm2, %v134_v19, %v146_v25 }
  0xe5   :  { %v145_v31 = vmul.f32 0.2, %v129_v29  ;;  %vm141_vm5 = vcmp.gt.f32.partialorder %v129_v29, 0.0  ;;  %v148_v34 = vsel %vm140_vm4, %v126_v22, %v144_v28 }
  0xe6   :  { %v151_v33 = vsel %vm143_vm3, %v137_v26, %v147_v30 }
  0xe7   :  { %v149_v35 = vsel %vm141_vm5, %v129_v29, %v145_v31  ;;  %v153_v36 = vpack.c.bf16 %v151_v33, %v150_v32 }
  0xe8   :  { %v152_v37 = vpack.c.bf16 %v149_v35, %v148_v34 }
  0xea   :  { %294 = vmatpush3.bf16.msra.mxu1 %v152_v37 }
  0xeb   :  { %295 = vmatprep.subr.bf16.mxu1 %v337_v15 }
  0xee   :  { %296 = vmatpush3.bf16.msra.mxu1 %v153_v36 }
  0xf1   :  { %298 = vmatmul.mubr.msk.bf16.vlgmr.msra.gmra.mrb[0].mxu1 %vm84_vm0, %v311_v38 }
 0x1c4   :  { %v210_v40 = vpop.f32.mrb[0].mxu1 }
 0x1c5   :  { %v211_v42 = vadd.f32 %v210_v40, %v161_v39  ;;  %v299_v43 = vpop.f32.mrb[1].mxu1 }
 0x1c6   :  { %v213_v44 = vpop.f32.mrb[2].mxu1 }
 0x1c7   :  { %vm217_vm6 = vcmp.gt.f32.partialorder %v211_v42, 0.0  ;;  %v219_v45 = vmul.f32 0.2, %v211_v42  ;;  %v214_v46 = vadd.f32 %v213_v44, %v166_v41  ;;  %v300_v47 = vpop.f32.mrb[3].mxu1 }
 0x1c9   :  { %v221_v48 = vsel %vm217_vm6, %v211_v42, %v219_v45  ;;  %vm218_vm7 = vcmp.gt.f32.partialorder %v214_v46, 0.0  ;;  %v220_v49 = vmul.f32 0.2, %v214_v46 }
 0x1ca   :  { %v236_v53 = vmul.f32 %v229_v50, %v221_v48 }
 0x1cb   :  { %v222_v52 = vsel %vm218_vm7, %v214_v46, %v220_v49 }
 0x1cc   :  { %v237_v54 = vmul.f32 %v234_v51, %v222_v52 }
 0x1ce   :  { %v238_v56 = vadd.f32 %v237_v54, %v236_v53 }
 0x1d0   :  { %v239_v57 = vrot.slane %v238_v56, 4 }
 0x1d2   :  { %v240_v59 = vadd.f32 %v239_v57, %v238_v56 }
 0x1d4   :  { %v241_v60 = vrot.slane %v240_v59, 2 }
 0x1d6   :  { %v242_v62 = vadd.f32 %v241_v60, %v240_v59 }
 0x1d8   :  { %v243_v0 = vrot.slane %v242_v62, 1 }
 0x1da   :  { %v244_v2 = vadd.f32 %v243_v0, %v242_v62 }
 0x1dc   :  { %v254_v3 = vadd.f32 %v253_v1, %v244_v2 }
 0x1de   :  { %255 = vst [vmem:[#allocation3] sm:$0x1] %v254_v3 }
 0x1df   :  { %323 = shalt.err (!%p320_p4)
}
 0x1e0   :  { %s324_s28 = scalar_lea.hbm %s444_s7, 16 }
 0x1e1   :  { %p325_p5 = scmp.ne.s32.totalorder %s444_s7, %s324_s28  ;;  %p328_p6 = scmp.lt.u32.totalorder %s324_s28, %s444_s7 }
 0x1e3   :  { %p330_p7 = pnand %p328_p6, %p325_p5 }
 0x1e5   :  { %333 = shalt.err (!%p330_p7)
}
 0x1e6   :  { %265 = dma.vmem_to_hbm [thread:$0]  %s263_s23, 16, %s444_s7, [#allocation4]  }
 0x1e7   :  { %334 = dma.done.wait [#allocation4], 16  }
 0x1e8   :  { %335 = vsyncadd [#allocation4], 4294967280 }
 0x1e9   :  { %269 = vsyncpa [#allocation4], 1 }

</bundles_post_ra>
